<compile_context>
chip_gen: v5e
topology: v5e:2x2
jax: 0.10.0
libtpu: 0.0.40
codegen_flags: <defaults>
</compile_context>

<pallas_src>
import functools

import jax
import jax.numpy as jnp
from jax import lax
from jax.experimental import pallas as pl
from jax.experimental.pallas import tpu as pltpu


# ----------------------------- kernel ---------------------------------------

def _hshift(a, s):
    """out[:, h] = a[:, h + s] with zero padding OOB (static s).  a: (nb, H, WC)."""
    if s == 0:
        return a
    h = a.shape[1]
    z = jnp.zeros((a.shape[0], abs(s), a.shape[2]), a.dtype)
    if s > 0:
        return jnp.concatenate([a[:, s:], z], axis=1)
    return jnp.concatenate([z, a[:, : h + s]], axis=1)


def _make_kernel(dilated):
    d = dilated

    def kernel(x_ref, wa_ref, ba_ref, wb_ref, bb_ref,
               wc_ref, bc_ref, wd_ref, bd_ref, out_ref):
        nb, H, WC = x_ref.shape
        M = nb * H

        x3 = x_ref[...].astype(jnp.float32)                   # (nb, H, WC)
        xm = x3.reshape(M, WC)                                 # fat-M operand

        # ---- branch 1 ----
        # conv3x1_1: 3 H-taps fused into one K=3*WC matmul (bf16), + bias, relu
        xa = jnp.concatenate([_hshift(x3, -1), x3, _hshift(x3, 1)], axis=-1)
        o1 = jnp.dot(xa.reshape(M, 3 * WC).astype(jnp.bfloat16), wa_ref[...],
                     preferred_element_type=jnp.float32) + ba_ref[...]
        o1 = jnp.maximum(o1, 0.0)
        # conv1x3_1 (W-shift folded into weight) + parallel_conv_1 + BN1, relu (f32)
        ob = jnp.concatenate([o1, xm], axis=-1)                # (M, 2*WC)
        o_ = jnp.dot(ob, wb_ref[...], preferred_element_type=jnp.float32) + bb_ref[...]
        o_ = jnp.maximum(o_, 0.0)

        # ---- branch 2 (dilated) ----
        o_3 = o_.reshape(nb, H, WC)
        xc = jnp.concatenate([_hshift(o_3, -d), o_3, _hshift(o_3, d)], axis=-1)
        o2 = jnp.dot(xc.reshape(M, 3 * WC).astype(jnp.bfloat16), wc_ref[...],
                     preferred_element_type=jnp.float32) + bc_ref[...]
        o2 = jnp.maximum(o2, 0.0)                              # relu(conv3x1_2)
        od = jnp.concatenate([o2, o_], axis=-1)                # (M, 2*WC)
        o3 = jnp.dot(od, wd_ref[...], preferred_element_type=jnp.float32) + bd_ref[...]

        out = jnp.maximum(o3 + xm, 0.0)                        # relu(out + input)
        out_ref[...] = out.reshape(nb, H, WC).astype(out_ref.dtype)

    return kernel


# ----------------------------- wrapper (glue) --------------------------------

def _bn_scale_shift(gamma, beta, mean, var, eps=1e-3):
    scale = gamma / jnp.sqrt(var + eps)
    return scale, beta - mean * scale


def _sep_w(w_oihw):
    """(Co, Ci, 3, 1) or (Co, Ci, 1, 3) OIHW conv weight -> (3, Ci, Co)."""
    w = w_oihw.reshape(w_oihw.shape[0], w_oihw.shape[1], 3)
    return jnp.transpose(w, (2, 1, 0))


def _block_diag(m, w):
    """Per-pixel (Ci,Co) channel mix -> (w*Ci, w*Co) on the (w,c)-flattened axis."""
    return jnp.kron(jnp.eye(w, dtype=m.dtype), m)


def _wconv_matrix(w3, w, dil):
    """3-tap conv along W (dilation dil, zero pad) as a (w*Ci, w*Co) matrix."""
    out = jnp.zeros((w * w3.shape[1], w * w3.shape[2]), w3.dtype)
    for k in range(3):
        off = (k - 1) * dil                       # input index = output + off
        sel = jnp.eye(w, k=-off, dtype=w3.dtype)  # sel[w_in, w_out]=1 iff w_in=w_out+off
        out = out + jnp.kron(sel, w3[k])
    return out


def _pick_images_per_block(n, h, target_m=128):
    """Largest divisor of n giving M = nb*h <= target (or the smallest possible)."""
    target = max(1, target_m // h)
    nb = 1
    for cand in range(1, n + 1):
        if n % cand == 0 and cand <= target:
            nb = cand
    return nb


def non_bottleneck_1d_rap_forward(x_nhwc, params, dilated, images_per_block=None):
    """x_nhwc: (N, H, W, C) float32.  Returns (N, H, W, C)."""
    x_nhwc = x_nhwc.astype(jnp.float32)
    N, H, W, C = x_nhwc.shape
    WC = W * C
    # Free trailing-dim merge (no transpose, no data movement).
    x = x_nhwc.reshape(N, H, WC)

    s1, t1 = _bn_scale_shift(params["bn1_gamma"], params["bn1_beta"],
                             params["bn1_mean"], params["bn1_var"])
    s2, t2 = _bn_scale_shift(params["bn2_gamma"], params["bn2_beta"],
                             params["bn2_mean"], params["bn2_var"])
    s1t, s2t = jnp.tile(s1, W), jnp.tile(s2, W)

    w31_1, w13_1 = _sep_w(params["w31_1"]), _sep_w(params["w13_1"])
    w31_2, w13_2 = _sep_w(params["w31_2"]), _sep_w(params["w13_2"])
    wp1 = params["wp1"][:, :, 0, 0].T
    wp2 = params["wp2"][:, :, 0, 0].T

    # Fused weights (built once at trace time).  Wa/Wc (pre-BN 3x1 branches) in
    # bf16; BN-scaled Wb/Wd kept f32 for accuracy (review-sanctioned split).
    Wa = jnp.concatenate([_block_diag(w31_1[k], W) for k in range(3)],
                         axis=0).astype(jnp.bfloat16)
    ba = jnp.tile(params["b31_1"], W).reshape(1, WC)

    Wb = jnp.concatenate([_wconv_matrix(w13_1, W, 1), _block_diag(wp1, W)],
                         axis=0) * s1t[None, :]
    bb = (jnp.tile(params["b13_1"] + params["bp1"], W) * s1t
          + jnp.tile(t1, W)).reshape(1, WC)

    Wc = jnp.concatenate([_block_diag(w31_2[k], W) for k in range(3)],
                         axis=0).astype(jnp.bfloat16)
    bc = jnp.tile(params["b31_2"], W).reshape(1, WC)

    Wd = jnp.concatenate([_wconv_matrix(w13_2, W, dilated), _block_diag(wp2, W)],
                         axis=0) * s2t[None, :]
    bd = (jnp.tile(params["b13_2"] + params["bp2"], W) * s2t
          + jnp.tile(t2, W)).reshape(1, WC)

    nb = images_per_block if images_per_block is not None else _pick_images_per_block(N, H)
    assert N % nb == 0, (N, nb)
    grid = (N // nb,)

    x_spec = pl.BlockSpec((nb, H, WC), lambda n: (n, 0, 0))
    # NOTE(v7x): these constant-index weight specs could use
    # pipeline_mode=pl.Buffered(1) to avoid double-buffering as C grows.
    w3_spec = pl.BlockSpec((3 * WC, WC), lambda n: (0, 0))
    w2_spec = pl.BlockSpec((2 * WC, WC), lambda n: (0, 0))
    b_spec = pl.BlockSpec((1, WC), lambda n: (0, 0))

    flops = 2 * N * H * WC * WC * (3 + 2 + 3 + 2)
    bytes_accessed = (4 * 2 * N * H * WC            # activations in/out (f32)
                      + 2 * 2 * 3 * WC * WC         # Wa, Wc (bf16)
                      + 4 * 2 * 2 * WC * WC         # Wb, Wd (f32)
                      + 4 * 4 * WC)                 # biases

    out = pl.pallas_call(
        _make_kernel(dilated),
        out_shape=jax.ShapeDtypeStruct((N, H, WC), jnp.float32),
        grid=grid,
        in_specs=[x_spec,
                  w3_spec, b_spec, w2_spec, b_spec,
                  w3_spec, b_spec, w2_spec, b_spec],
        out_specs=x_spec,
        compiler_params=pltpu.CompilerParams(dimension_semantics=("parallel",)),
        cost_estimate=pl.CostEstimate(flops=flops, transcendentals=0,
                                      bytes_accessed=bytes_accessed),
    )(x, Wa, ba, Wb, bb, Wc, bc, Wd, bd)

    return out.reshape(N, H, W, C)                  # free trailing-dim split


# --------------------------- pure-JAX reference (NCHW) ------------------------

def _conv_ref(x, w, b, padding, rhs_dilation):
    y = lax.conv_general_dilated(
        x, w, window_strides=(1, 1), padding=padding,
        rhs_dilation=rhs_dilation,
        dimension_numbers=("NCHW", "OIHW", "NCHW"))
    return y + b.reshape(1, -1, 1, 1)


def reference_forward(x, p, dilated):
    relu = lambda a: jnp.maximum(a, 0.0)
    bn = lambda a, g, b, m, v: ((a - m.reshape(1, -1, 1, 1))
                                / jnp.sqrt(v.reshape(1, -1, 1, 1) + 1e-3)
                                * g.reshape(1, -1, 1, 1) + b.reshape(1, -1, 1, 1))
    d = dilated
    o = relu(_conv_ref(x, p["w31_1"], p["b31_1"], [(1, 1), (0, 0)], (1, 1)))
    o = _conv_ref(o, p["w13_1"], p["b13_1"], [(0, 0), (1, 1)], (1, 1))
    o = o + _conv_ref(x, p["wp1"], p["bp1"], [(0, 0), (0, 0)], (1, 1))
    o = bn(o, p["bn1_gamma"], p["bn1_beta"], p["bn1_mean"], p["bn1_var"])
    o_ = relu(o)
    o = relu(_conv_ref(o_, p["w31_2"], p["b31_2"], [(d, d), (0, 0)], (d, 1)))
    o = _conv_ref(o, p["w13_2"], p["b13_2"], [(0, 0), (d, d)], (1, d))
    o = o + _conv_ref(o_, p["wp2"], p["bp2"], [(0, 0), (0, 0)], (1, 1))
    o = bn(o, p["bn2_gamma"], p["bn2_beta"], p["bn2_mean"], p["bn2_var"])
    return relu(o + x)


# --------------------------------- params ------------------------------------

def init_params(key, C):
    ks = jax.random.split(key, 20)
    nrm = lambda k, s, sc=0.1: sc * jax.random.normal(k, s, jnp.float32)
    return {
        "w31_1": nrm(ks[0], (C, C, 3, 1)), "b31_1": nrm(ks[1], (C,)),
        "w13_1": nrm(ks[2], (C, C, 1, 3)), "b13_1": nrm(ks[3], (C,)),
        "wp1":   nrm(ks[4], (C, C, 1, 1)), "bp1":   nrm(ks[5], (C,)),
        "bn1_gamma": 1.0 + nrm(ks[6], (C,)), "bn1_beta": nrm(ks[7], (C,)),
        "bn1_mean":  nrm(ks[8], (C,)),
        "bn1_var":   jax.random.uniform(ks[9], (C,), jnp.float32, 0.5, 1.5),
        "w31_2": nrm(ks[10], (C, C, 3, 1)), "b31_2": nrm(ks[11], (C,)),
        "w13_2": nrm(ks[12], (C, C, 1, 3)), "b13_2": nrm(ks[13], (C,)),
        "wp2":   nrm(ks[14], (C, C, 1, 1)), "bp2":   nrm(ks[15], (C,)),
        "bn2_gamma": 1.0 + nrm(ks[16], (C,)), "bn2_beta": nrm(ks[17], (C,)),
        "bn2_mean":  nrm(ks[18], (C,)),
        "bn2_var":   jax.random.uniform(ks[19], (C,), jnp.float32, 0.5, 1.5),
    }


# ----------------------------------- main -------------------------------------

if __name__ == "__main__":
    N, C, H, W = 2, 8, 16, 16        # W*C = 128 -> lane-dense layout
    dilated = 2
    dropprob = 0.0                   # dropout branch skipped (matches eval / p == 0)

    key = jax.random.PRNGKey(0)
    kx, kp = jax.random.split(key)
    x_nhwc = jax.random.normal(kx, (N, H, W, C), jnp.float32)
    params = init_params(kp, C)

    fwd = jax.jit(functools.partial(non_bottleneck_1d_rap_forward, dilated=dilated))
    out = jax.block_until_ready(fwd(x_nhwc, params))

    # Correctness check (outside the perf path): reference runs in NCHW.
    x_nchw = jnp.transpose(x_nhwc, (0, 3, 1, 2))
    ref_nchw = reference_forward(x_nchw, params, dilated)
    ref_nhwc = jnp.transpose(ref_nchw, (0, 2, 3, 1))

    max_err = float(jnp.max(jnp.abs(out - ref_nhwc)))
    assert out.shape == (N, H, W, C), out.shape
    # Tolerance widened from 5e-4 because the two pre-BN 3x1 matmuls now run
    # with bf16 weights/operands (f32 accumulation), per the perf review.
    assert max_err < 3e-2, f"mismatch vs reference: {max_err}"

    print("KERNEL_OK")
</pallas_src>

<mosaic_0001>
module attributes {stable_mosaic.version = 11 : i64} {
  func.func @kernel(%arg0: i32, %arg1: memref<2x16x128xf32, #tpu.memory_space<vmem>>, %arg2: memref<384x128xbf16, #tpu.memory_space<vmem>>, %arg3: memref<1x128xf32, #tpu.memory_space<vmem>>, %arg4: memref<256x128xf32, #tpu.memory_space<vmem>>, %arg5: memref<1x128xf32, #tpu.memory_space<vmem>>, %arg6: memref<384x128xbf16, #tpu.memory_space<vmem>>, %arg7: memref<1x128xf32, #tpu.memory_space<vmem>>, %arg8: memref<256x128xf32, #tpu.memory_space<vmem>>, %arg9: memref<1x128xf32, #tpu.memory_space<vmem>>, %arg10: memref<2x16x128xf32, #tpu.memory_space<vmem>>) attributes {dimension_semantics = [#tpu.dimension_semantics<parallel>], iteration_bounds = array<i64: 1>, scalar_prefetch = 0 : i64, scratch_operands = 0 : i64, tpu.core_type = #tpu.core_type<tc>, window_params = [{transform_indices = @transform_0, window_bounds = array<i64: 2, 16, 128>}, {pipeline_mode = #tpu.pipeline_mode<synchronous>, transform_indices = @transform_1, window_bounds = array<i64: 384, 128>}, {pipeline_mode = #tpu.pipeline_mode<synchronous>, transform_indices = @transform_2, window_bounds = array<i64: 1, 128>}, {pipeline_mode = #tpu.pipeline_mode<synchronous>, transform_indices = @transform_3, window_bounds = array<i64: 256, 128>}, {pipeline_mode = #tpu.pipeline_mode<synchronous>, transform_indices = @transform_4, window_bounds = array<i64: 1, 128>}, {pipeline_mode = #tpu.pipeline_mode<synchronous>, transform_indices = @transform_5, window_bounds = array<i64: 384, 128>}, {pipeline_mode = #tpu.pipeline_mode<synchronous>, transform_indices = @transform_6, window_bounds = array<i64: 1, 128>}, {pipeline_mode = #tpu.pipeline_mode<synchronous>, transform_indices = @transform_7, window_bounds = array<i64: 256, 128>}, {pipeline_mode = #tpu.pipeline_mode<synchronous>, transform_indices = @transform_8, window_bounds = array<i64: 1, 128>}, {transform_indices = @transform_9, window_bounds = array<i64: 2, 16, 128>}]} {
    %c0 = arith.constant 0 : index
    %c0_0 = arith.constant 0 : index
    %c0_1 = arith.constant 0 : index
    %0 = vector.load %arg1[%c0, %c0_0, %c0_1] : memref<2x16x128xf32, #tpu.memory_space<vmem>>, vector<2x16x128xf32>
    %1 = vector.shape_cast %0 : vector<2x16x128xf32> to vector<32x128xf32>
    %cst = arith.constant 0.000000e+00 : f32
    %2 = vector.broadcast %cst : f32 to vector<2x1x128xf32>
    %3 = vector.extract_strided_slice %0 {offsets = [0, 0, 0], sizes = [2, 15, 128], strides = [1, 1, 1]} : vector<2x16x128xf32> to vector<2x15x128xf32>
    %4 = tpu.concatenate %2, %3 in 1 : vector<2x1x128xf32>, vector<2x15x128xf32> -> vector<2x16x128xf32>
    %cst_2 = arith.constant 0.000000e+00 : f32
    %5 = vector.broadcast %cst_2 : f32 to vector<2x1x128xf32>
    %6 = vector.extract_strided_slice %0 {offsets = [0, 1, 0], sizes = [2, 15, 128], strides = [1, 1, 1]} : vector<2x16x128xf32> to vector<2x15x128xf32>
    %7 = tpu.concatenate %6, %5 in 1 : vector<2x15x128xf32>, vector<2x1x128xf32> -> vector<2x16x128xf32>
    %8 = tpu.concatenate %4, %0, %7 in 2 : vector<2x16x128xf32>, vector<2x16x128xf32>, vector<2x16x128xf32> -> vector<2x16x384xf32>
    %9 = vector.shape_cast %8 : vector<2x16x384xf32> to vector<32x384xf32>
    %10 = arith.truncf %9 : vector<32x384xf32> to vector<32x384xbf16>
    %c0_3 = arith.constant 0 : index
    %c0_4 = arith.constant 0 : index
    %11 = vector.load %arg2[%c0_3, %c0_4] : memref<384x128xbf16, #tpu.memory_space<vmem>>, vector<384x128xbf16>
    %cst_5 = arith.constant dense<0.000000e+00> : vector<32x128xf32>
    %12 = tpu.matmul %10, %11, %cst_5 {dimension_numbers = #tpu.dot_dimension_numbers<[1], [0], [0], [1], [0, 0, 1, 1], [], []>} : vector<32x384xbf16>, vector<384x128xbf16>, vector<32x128xf32> -> vector<32x128xf32>
    %c0_6 = arith.constant 0 : index
    %c0_7 = arith.constant 0 : index
    %13 = vector.load %arg3[%c0_6, %c0_7] : memref<1x128xf32, #tpu.memory_space<vmem>>, vector<1x128xf32>
    %14 = vector.broadcast %13 : vector<1x128xf32> to vector<32x128xf32>
    %15 = arith.addf %12, %14 : vector<32x128xf32>
    %cst_8 = arith.constant 0.000000e+00 : f32
    %16 = vector.broadcast %cst_8 : f32 to vector<32x128xf32>
    %17 = arith.maximumf %15, %16 : vector<32x128xf32>
    %18 = tpu.concatenate %17, %1 in 1 : vector<32x128xf32>, vector<32x128xf32> -> vector<32x256xf32>
    %c0_9 = arith.constant 0 : index
    %c0_10 = arith.constant 0 : index
    %19 = vector.load %arg4[%c0_9, %c0_10] : memref<256x128xf32, #tpu.memory_space<vmem>>, vector<256x128xf32>
    %cst_11 = arith.constant dense<0.000000e+00> : vector<32x128xf32>
    %20 = tpu.matmul %18, %19, %cst_11 {dimension_numbers = #tpu.dot_dimension_numbers<[1], [0], [0], [1], [0, 0, 1, 1], [], []>} : vector<32x256xf32>, vector<256x128xf32>, vector<32x128xf32> -> vector<32x128xf32>
    %c0_12 = arith.constant 0 : index
    %c0_13 = arith.constant 0 : index
    %21 = vector.load %arg5[%c0_12, %c0_13] : memref<1x128xf32, #tpu.memory_space<vmem>>, vector<1x128xf32>
    %22 = vector.broadcast %21 : vector<1x128xf32> to vector<32x128xf32>
    %23 = arith.addf %20, %22 : vector<32x128xf32>
    %cst_14 = arith.constant 0.000000e+00 : f32
    %24 = vector.broadcast %cst_14 : f32 to vector<32x128xf32>
    %25 = arith.maximumf %23, %24 : vector<32x128xf32>
    %26 = vector.shape_cast %25 : vector<32x128xf32> to vector<2x16x128xf32>
    %cst_15 = arith.constant 0.000000e+00 : f32
    %27 = vector.broadcast %cst_15 : f32 to vector<2x2x128xf32>
    %28 = vector.extract_strided_slice %26 {offsets = [0, 0, 0], sizes = [2, 14, 128], strides = [1, 1, 1]} : vector<2x16x128xf32> to vector<2x14x128xf32>
    %29 = tpu.concatenate %27, %28 in 1 : vector<2x2x128xf32>, vector<2x14x128xf32> -> vector<2x16x128xf32>
    %cst_16 = arith.constant 0.000000e+00 : f32
    %30 = vector.broadcast %cst_16 : f32 to vector<2x2x128xf32>
    %31 = vector.extract_strided_slice %26 {offsets = [0, 2, 0], sizes = [2, 14, 128], strides = [1, 1, 1]} : vector<2x16x128xf32> to vector<2x14x128xf32>
    %32 = tpu.concatenate %31, %30 in 1 : vector<2x14x128xf32>, vector<2x2x128xf32> -> vector<2x16x128xf32>
    %33 = tpu.concatenate %29, %26, %32 in 2 : vector<2x16x128xf32>, vector<2x16x128xf32>, vector<2x16x128xf32> -> vector<2x16x384xf32>
    %34 = vector.shape_cast %33 : vector<2x16x384xf32> to vector<32x384xf32>
    %35 = arith.truncf %34 : vector<32x384xf32> to vector<32x384xbf16>
    %c0_17 = arith.constant 0 : index
    %c0_18 = arith.constant 0 : index
    %36 = vector.load %arg6[%c0_17, %c0_18] : memref<384x128xbf16, #tpu.memory_space<vmem>>, vector<384x128xbf16>
    %cst_19 = arith.constant dense<0.000000e+00> : vector<32x128xf32>
    %37 = tpu.matmul %35, %36, %cst_19 {dimension_numbers = #tpu.dot_dimension_numbers<[1], [0], [0], [1], [0, 0, 1, 1], [], []>} : vector<32x384xbf16>, vector<384x128xbf16>, vector<32x128xf32> -> vector<32x128xf32>
    %c0_20 = arith.constant 0 : index
    %c0_21 = arith.constant 0 : index
    %38 = vector.load %arg7[%c0_20, %c0_21] : memref<1x128xf32, #tpu.memory_space<vmem>>, vector<1x128xf32>
    %39 = vector.broadcast %38 : vector<1x128xf32> to vector<32x128xf32>
    %40 = arith.addf %37, %39 : vector<32x128xf32>
    %cst_22 = arith.constant 0.000000e+00 : f32
    %41 = vector.broadcast %cst_22 : f32 to vector<32x128xf32>
    %42 = arith.maximumf %40, %41 : vector<32x128xf32>
    %43 = tpu.concatenate %42, %25 in 1 : vector<32x128xf32>, vector<32x128xf32> -> vector<32x256xf32>
    %c0_23 = arith.constant 0 : index
    %c0_24 = arith.constant 0 : index
    %44 = vector.load %arg8[%c0_23, %c0_24] : memref<256x128xf32, #tpu.memory_space<vmem>>, vector<256x128xf32>
    %cst_25 = arith.constant dense<0.000000e+00> : vector<32x128xf32>
    %45 = tpu.matmul %43, %44, %cst_25 {dimension_numbers = #tpu.dot_dimension_numbers<[1], [0], [0], [1], [0, 0, 1, 1], [], []>} : vector<32x256xf32>, vector<256x128xf32>, vector<32x128xf32> -> vector<32x128xf32>
    %c0_26 = arith.constant 0 : index
    %c0_27 = arith.constant 0 : index
    %46 = vector.load %arg9[%c0_26, %c0_27] : memref<1x128xf32, #tpu.memory_space<vmem>>, vector<1x128xf32>
    %47 = vector.broadcast %46 : vector<1x128xf32> to vector<32x128xf32>
    %48 = arith.addf %45, %47 : vector<32x128xf32>
    %49 = arith.addf %48, %1 : vector<32x128xf32>
    %cst_28 = arith.constant 0.000000e+00 : f32
    %50 = vector.broadcast %cst_28 : f32 to vector<32x128xf32>
    %51 = arith.maximumf %49, %50 : vector<32x128xf32>
    %52 = vector.shape_cast %51 : vector<32x128xf32> to vector<2x16x128xf32>
    %c0_29 = arith.constant 0 : index
    %c0_30 = arith.constant 0 : index
    %c0_31 = arith.constant 0 : index
    %53 = vector.load %arg10[%c0_29, %c0_30, %c0_31] : memref<2x16x128xf32, #tpu.memory_space<vmem>>, vector<2x16x128xf32>
    tpu.vector_store %arg10[%c0_29, %c0_30, %c0_31], %52 {strides = array<i32>} : memref<2x16x128xf32, #tpu.memory_space<vmem>>, vector<2x16x128xf32>,
    return
  }
  func.func @transform_0(%arg0: i32) -> (i32, i32, i32) {
    %c0_i32 = arith.constant 0 : i32
    %c0_i32_0 = arith.constant 0 : i32
    %c0_i32_1 = arith.constant 0 : i32
    return %arg0, %c0_i32, %c0_i32_0 : i32, i32, i32
  }
  func.func @transform_1(%arg0: i32) -> (i32, i32) {
    %c0_i32 = arith.constant 0 : i32
    %c0_i32_0 = arith.constant 0 : i32
    %c0_i32_1 = arith.constant 0 : i32
    return %c0_i32, %c0_i32_0 : i32, i32
  }
  func.func @transform_2(%arg0: i32) -> (i32, i32) {
    %c0_i32 = arith.constant 0 : i32
    %c0_i32_0 = arith.constant 0 : i32
    %c0_i32_1 = arith.constant 0 : i32
    return %c0_i32, %c0_i32_0 : i32, i32
  }
  func.func @transform_3(%arg0: i32) -> (i32, i32) {
    %c0_i32 = arith.constant 0 : i32
    %c0_i32_0 = arith.constant 0 : i32
    %c0_i32_1 = arith.constant 0 : i32
    return %c0_i32, %c0_i32_0 : i32, i32
  }
  func.func @transform_4(%arg0: i32) -> (i32, i32) {
    %c0_i32 = arith.constant 0 : i32
    %c0_i32_0 = arith.constant 0 : i32
    %c0_i32_1 = arith.constant 0 : i32
    return %c0_i32, %c0_i32_0 : i32, i32
  }
  func.func @transform_5(%arg0: i32) -> (i32, i32) {
    %c0_i32 = arith.constant 0 : i32
    %c0_i32_0 = arith.constant 0 : i32
    %c0_i32_1 = arith.constant 0 : i32
    return %c0_i32, %c0_i32_0 : i32, i32
  }
  func.func @transform_6(%arg0: i32) -> (i32, i32) {
    %c0_i32 = arith.constant 0 : i32
    %c0_i32_0 = arith.constant 0 : i32
    %c0_i32_1 = arith.constant 0 : i32
    return %c0_i32, %c0_i32_0 : i32, i32
  }
  func.func @transform_7(%arg0: i32) -> (i32, i32) {
    %c0_i32 = arith.constant 0 : i32
    %c0_i32_0 = arith.constant 0 : i32
    %c0_i32_1 = arith.constant 0 : i32
    return %c0_i32, %c0_i32_0 : i32, i32
  }
  func.func @transform_8(%arg0: i32) -> (i32, i32) {
    %c0_i32 = arith.constant 0 : i32
    %c0_i32_0 = arith.constant 0 : i32
    %c0_i32_1 = arith.constant 0 : i32
    return %c0_i32, %c0_i32_0 : i32, i32
  }
  func.func @transform_9(%arg0: i32) -> (i32, i32, i32) {
    %c0_i32 = arith.constant 0 : i32
    %c0_i32_0 = arith.constant 0 : i32
    %c0_i32_1 = arith.constant 0 : i32
    return %arg0, %c0_i32, %c0_i32_0 : i32, i32, i32
  }
}

</mosaic_0001>

<bundles_post_ra>
// kernel: tile.50
= control target key start
LH: loop header
LB: loop body
LE: loop exit
PB: predicated region body
PF: predicated region fallthrough
CT: control target
= control target key end

     0   :  { %s28_s0 = inlined_call_operand.vmem [shape: f32[8], index: 0, kind: input, shape index: {}]   ;;  %s29_s1 = inlined_call_operand.vmem [shape: f32[16,8], index: 1, kind: output, shape index: {}]  }
   0x1   :  { %v4_v0 = vld [vmem:[%s28_s0] ss:$0 sm:$0xff] }
   0x2   :  { %5 = vst [vmem:[%s29_s1] sm:$0xff] %v4_v0 }
   0x3   :  { %8 = vst [vmem:[%s29_s1 + $0x8] sm:$0xff] %v4_v0 }

// kernel: mul.34
= control target key start
LH: loop header
LB: loop body
LE: loop exit
PB: predicated region body
PF: predicated region fallthrough
CT: control target
= control target key end

     0   :  { %s131_s10 = smov 120   ;;  %s132_s11 = smov 104   ;;  %vm3_vm0 = vcmask 64512   ;;  %vm9_vm1 = vcmask 1048512   ;;  %vm15_vm2 = vcmask 982912   ;;  %vm21_vm3 = vcmask 917312   ;;  %s207_s0 = inlined_call_operand.vmem [shape: f32[16,8], index: 0, kind: input, shape index: {}]   ;;  %s208_s1 = inlined_call_operand.vmem [shape: f32[128], index: 1, kind: output, shape index: {}]  }
   0x1   :  { %v101_v0 = vld [vmem:[%s207_s0 + $0xf] sm:$0x1]   ;;  %v103_v1 = vld [vmem:[%s207_s0 + $0xd] sm:$0x1]   ;;  %v105_v2 = vld [vmem:[%s207_s0 + $0xb] sm:$0x1]  }
   0x2   :  { %7 = vrot.lane.b32.xlu0 %v101_v0, %s131_s10  ;;  %19 = vrot.lane.b32.xlu1 %v103_v1, %s132_s11  ;;  %s133_s14 = smov 88   ;;  %v102_v3 = vld [vmem:[%s207_s0 + $0xe] sm:$0x1]   ;;  %v104_v4 = vld [vmem:[%s207_s0 + $0xc] sm:$0x1]   ;;  %s134_s19 = smov 112  }
   0x3   :  { %31 = vrot.lane.b32.xlu2 %v105_v2, %s133_s14  ;;  %s135_s20 = smov 96   ;;  %v106_v5 = vld [vmem:[%s207_s0 + $0xa] sm:$0x1]   ;;  %s136_s23 = smov 80   ;;  %v107_v6 = vld [vmem:[%s207_s0 + $0x9] sm:$0x1]  }
   0x4   :  { %v108_v7 = vld [vmem:[%s207_s0 + $0x8] sm:$0x1]   ;;  %s137_s28 = smov 72   ;;  %s138_s29 = smov 64   ;;  %v109_v8 = vld [vmem:[%s207_s0 + $0x7] sm:$0x1]  }
   0x5   :  { %s139_s3 = smov 56   ;;  %v110_v9 = vld [vmem:[%s207_s0 + $0x6] sm:$0x1]   ;;  %v111_v10 = vld [vmem:[%s207_s0 + $0x5] sm:$0x1]   ;;  %s140_s8 = smov 48  }
   0x6   :  { %s141_s9 = smov 40   ;;  %v112_v11 = vld [vmem:[%s207_s0 + $0x4] sm:$0x1]   ;;  %s142_s12 = smov 32   ;;  %v113_v12 = vld [vmem:[%s207_s0 + $0x3] sm:$0x1]  }
   0x7   :  { %v114_v13 = vld [vmem:[%s207_s0 + $0x2] sm:$0x1]   ;;  %s143_s17 = smov 24   ;;  %s144_s18 = smov 16   ;;  %v115_v14 = vld [vmem:[%s207_s0 + $0x1] sm:$0x1]  }
   0x8   :  { %s145_s21 = smov 8   ;;  %v2_v15 = vld [vmem:[%s207_s0] sm:$0x1]   ;;  %vm27_vm4 = vcmask 851712   ;;  %vm33_vm5 = vcmask 786112   ;;  %vm39_vm6 = vcmask 720512  }
   0x9   :  { %4 = vst.msk [vmem:[#allocation0] sm:$0x1] %vm3_vm0, %v2_v15   ;;  %vm45_vm7 = vcmask 654912   ;;  %vm51_vm8 = vcmask 589312   ;;  %vm57_vm9 = vcmask 523712   ;;  %vm63_vm10 = vcmask 458112  }
   0xa   :  { %13 = vrot.lane.b32.xlu0 %v102_v3, %s134_s19  ;;  %25 = vrot.lane.b32.xlu1 %v104_v4, %s135_s20  ;;  %vm69_vm11 = vcmask 392512   ;;  %vm75_vm12 = vcmask 326912   ;;  %vm81_vm13 = vcmask 261312   ;;  %vm87_vm14 = vcmask 195712  }
   0xb   :  { %37 = vrot.lane.b32.xlu2 %v106_v5, %s136_s23  ;;  %vm93_vm15 = vcmask 130112  }
  0x12   :  { %43 = vrot.lane.b32.xlu0 %v107_v6, %s137_s28  ;;  %49 = vrot.lane.b32.xlu1 %v108_v7, %s138_s29 }
  0x13   :  { %55 = vrot.lane.b32.xlu2 %v109_v8, %s139_s3 }
  0x1a   :  { %61 = vrot.lane.b32.xlu0 %v110_v9, %s140_s8  ;;  %67 = vrot.lane.b32.xlu1 %v111_v10, %s141_s9 }
  0x1b   :  { %73 = vrot.lane.b32.xlu2 %v112_v11, %s142_s12 }
  0x22   :  { %79 = vrot.lane.b32.xlu0 %v113_v12, %s143_s17  ;;  %85 = vrot.lane.b32.xlu1 %v114_v13, %s144_s18 }
  0x23   :  { %91 = vrot.lane.b32.xlu2 %v115_v14, %s145_s21 }
  0x5d   :  { %v32_v16 = vpop.permute.xlu2 %31  }
  0x65   :  { %v38_v17 = vpop.permute.xlu2 %37  }
  0x6d   :  { %v56_v18 = vpop.permute.xlu2 %55  }
  0x74   :  { %v8_v19 = vpop.permute.xlu0 %7   ;;  %v20_v20 = vpop.permute.xlu1 %19  }
  0x75   :  { %10 = vst.msk [vmem:[#allocation0] sm:$0x1] %vm9_vm1, %v8_v19   ;;  %v74_v21 = vpop.permute.xlu2 %73  }
  0x7c   :  { %v14_v22 = vpop.permute.xlu0 %13   ;;  %v26_v23 = vpop.permute.xlu1 %25  }
  0x7d   :  { %16 = vst.msk [vmem:[#allocation0] sm:$0x1] %vm15_vm2, %v14_v22   ;;  %v92_v24 = vpop.permute.xlu2 %91  }
  0x7e   :  { %22 = vst.msk [vmem:[#allocation0] sm:$0x1] %vm21_vm3, %v20_v20  }
  0x7f   :  { %28 = vst.msk [vmem:[#allocation0] sm:$0x1] %vm27_vm4, %v26_v23  }
  0x80   :  { %34 = vst.msk [vmem:[#allocation0] sm:$0x1] %vm33_vm5, %v32_v16  }
  0x81   :  { %40 = vst.msk [vmem:[#allocation0] sm:$0x1] %vm39_vm6, %v38_v17  }
  0x84   :  { %v44_v25 = vpop.permute.xlu0 %43   ;;  %v50_v26 = vpop.permute.xlu1 %49  }
  0x85   :  { %46 = vst.msk [vmem:[#allocation0] sm:$0x1] %vm45_vm7, %v44_v25  }
  0x86   :  { %52 = vst.msk [vmem:[#allocation0] sm:$0x1] %vm51_vm8, %v50_v26  }
  0x87   :  { %58 = vst.msk [vmem:[#allocation0] sm:$0x1] %vm57_vm9, %v56_v18  }
  0x8c   :  { %v62_v27 = vpop.permute.xlu0 %61   ;;  %v68_v28 = vpop.permute.xlu1 %67  }
  0x8d   :  { %64 = vst.msk [vmem:[#allocation0] sm:$0x1] %vm63_vm10, %v62_v27  }
  0x8e   :  { %70 = vst.msk [vmem:[#allocation0] sm:$0x1] %vm69_vm11, %v68_v28  }
  0x8f   :  { %76 = vst.msk [vmem:[#allocation0] sm:$0x1] %vm75_vm12, %v74_v21  }
  0x94   :  { %v80_v29 = vpop.permute.xlu0 %79   ;;  %v86_v30 = vpop.permute.xlu1 %85  }
  0x95   :  { %82 = vst.msk [vmem:[#allocation0] sm:$0x1] %vm81_vm13, %v80_v29  }
  0x96   :  { %88 = vst.msk [vmem:[#allocation0] sm:$0x1] %vm87_vm14, %v86_v30  }
  0x97   :  { %94 = vst.msk [vmem:[#allocation0] sm:$0x1] %vm93_vm15, %v92_v24  }
  0x9e   :  { %v97_v31 = vld [vmem:[#allocation0] sm:$0x1] }
  0x9f   :  { %100 = vst [vmem:[%s208_s1] sm:$0x1] %v97_v31 }

// kernel: non_bottleneck_1d_rap_forward.1
= control target key start
LH: loop header
LB: loop body
LE: loop exit
PB: predicated region body
PF: predicated region fallthrough
CT: control target
= control target key end

     0   :  { %vm40_vm0 = vcmask 1040384   ;;  %vm53_vm1 = vcmask 1046528   ;;  %vm1135_vm3 = vmmov 1   ;;  %vm431_vm6 = vcmask 1041408   ;;  %s1652_s1 = inlined_call_operand.vmem [shape: bf16[384,128], index: 1, kind: input, shape index: {}]   ;;  %s1653_s2 = inlined_call_operand.vmem [shape: f32[1,128], index: 2, kind: input, shape index: {}]   ;;  %s1654_s3 = inlined_call_operand.vmem [shape: f32[256,128], index: 3, kind: input, shape index: {}]   ;;  %s1655_s0 = inlined_call_operand.vmem [shape: f32[2,16,128], index: 0, kind: input, shape index: {}]   ;;  %s1656_s4 = inlined_call_operand.vmem [shape: f32[1,128], index: 4, kind: input, shape index: {}]   ;;  %s1657_s5 = inlined_call_operand.vmem [shape: bf16[384,128], index: 5, kind: input, shape index: {}]   ;;  %s1658_s6 = inlined_call_operand.vmem [shape: f32[1,128], index: 6, kind: input, shape index: {}]   ;;  %s1659_s7 = inlined_call_operand.vmem [shape: f32[256,128], index: 7, kind: input, shape index: {}]   ;;  %s1660_s8 = inlined_call_operand.vmem [shape: f32[1,128], index: 8, kind: input, shape index: {}]   ;;  %s1661_s9 = inlined_call_operand.vmem [shape: f32[2,16,128], index: 9, kind: output, shape index: {}]  }
   0x1   :  { %v1057_v0 = vld [vmem:[%s1652_s1 + $0x38] sm:$0xff]  ;;  %v1056_v3 = vld [vmem:[%s1652_s1 + $0x30] sm:$0xff]  ;;  %v1055_v6 = vld [vmem:[%s1652_s1 + $0x28] sm:$0xff]  ;;  %vm444_vm8 = vcmask 1045504  }
   0x2   :  { %v1065_v1 = vld [vmem:[%s1652_s1 + $0x78] sm:$0xff]  ;;  %268 = vmatpush.bf16.msra.mxu0 %v1057_v0  ;;  %v1064_v4 = vld [vmem:[%s1652_s1 + $0x70] sm:$0xff]  ;;  %v1063_v7 = vld [vmem:[%s1652_s1 + $0x68] sm:$0xff] }
   0x3   :  { %v1073_v2 = vld [vmem:[%s1652_s1 + $0xb8] sm:$0xff]  ;;  %287 = vmatpush.bf16.msra.mxu1 %v1065_v1  ;;  %v1072_v5 = vld [vmem:[%s1652_s1 + $0xb0] sm:$0xff]  ;;  %v1071_v8 = vld [vmem:[%s1652_s1 + $0xa8] sm:$0xff] }
   0x4   :  { %306 = vmatpush.bf16.msra.mxu2 %v1073_v2  ;;  %v1054_v9 = vld [vmem:[%s1652_s1 + $0x20] sm:$0xff]  ;;  %v1053_v12 = vld [vmem:[%s1652_s1 + $0x18] sm:$0xff]  ;;  %v1052_v15 = vld [vmem:[%s1652_s1 + $0x10] sm:$0xff] }
   0x5   :  { %v1062_v10 = vld [vmem:[%s1652_s1 + $0x60] sm:$0xff]  ;;  %v1061_v13 = vld [vmem:[%s1652_s1 + $0x58] sm:$0xff]  ;;  %v1060_v16 = vld [vmem:[%s1652_s1 + $0x50] sm:$0xff] }
   0x6   :  { %269 = vmatpush.bf16.msra.mxu0 %v1056_v3  ;;  %v1070_v11 = vld [vmem:[%s1652_s1 + $0xa0] sm:$0xff]  ;;  %v1069_v14 = vld [vmem:[%s1652_s1 + $0x98] sm:$0xff]  ;;  %v343_v18 = vld [vmem:[%s1654_s3 + $0x70] sm:$0xff] }
   0x7   :  { %288 = vmatpush.bf16.msra.mxu1 %v1064_v4  ;;  %v344_v17 = vld [vmem:[%s1654_s3 + $0x78] sm:$0xff]  ;;  %v1068_v19 = vld [vmem:[%s1652_s1 + $0x90] sm:$0xff]  ;;  %v1249_v20 = vld [vmem:[%s1655_s0] sm:$0xff] }
   0x8   :  { %307 = vmatpush.bf16.msra.mxu2 %v1072_v5  ;;  %v1254_v21 = vld [vmem:[%s1655_s0 + $0x8] sm:$0xff]  ;;  %365 = vmatpush.msra.mxu3 %v344_v17  ;;  %v41_v25 = vrot.slane %v1249_v20, 7  ;;  %v341_v27 = vld [vmem:[%s1654_s3 + $0x60] sm:$0xff]  ;;  %v54_v29 = vrot.slane %v1249_v20, 1  ;;  %v340_v31 = vld [vmem:[%s1654_s3 + $0x58] sm:$0xff] }
   0x9   :  { %v342_v22 = vld [vmem:[%s1654_s3 + $0x68] sm:$0xff]  ;;  %v42_v26 = vrot.slane %v1254_v21, 7  ;;  %v55_v30 = vrot.slane %v1254_v21, 1  ;;  %v1050_v32 = vld [vmem:[%s1652_s1] sm:$0xff]  ;;  %v339_v35 = vld [vmem:[%s1654_s3 + $0x50] sm:$0xff]  ;;  %v67_v40 = vpack.c.bf16 %v1254_v21, %v1249_v20 }
   0xa   :  { %270 = vmatpush.bf16.msra.mxu0 %v1055_v6  ;;  %366 = vmatpush.msra.mxu3 %v343_v18  ;;  %v1051_v23 = vld [vmem:[%s1652_s1 + $0x8] sm:$0xff]  ;;  %v1058_v33 = vld [vmem:[%s1652_s1 + $0x40] sm:$0xff]  ;;  %vm926_vm2 = vmneg %vm40_vm0 }
   0xb   :  { %289 = vmatpush.bf16.msra.mxu1 %v1063_v7  ;;  %v1059_v24 = vld [vmem:[%s1652_s1 + $0x48] sm:$0xff]  ;;  %v43_v34 = vsel %vm40_vm0, %v41_v25, %v42_v26  ;;  %v1066_v36 = vld [vmem:[%s1652_s1 + $0x80] sm:$0xff]  ;;  %v56_v37 = vsel %vm53_vm1, %v54_v29, %v55_v30  ;;  %v360_v38 = vld [vmem:[%s1654_s3 + $0xf8] sm:$0xff] }
   0xc   :  { %308 = vmatpush.bf16.msra.mxu2 %v1071_v8  ;;  %v1067_v28 = vld [vmem:[%s1652_s1 + $0x88] sm:$0xff]  ;;  %367 = vmatpush.msra.mxu3 %v342_v22  ;;  %v928_v39 = vpack.c.bf16 %v43_v34, %v41_v25  ;;  %vm1302_vm4 = vmpackc.low %vm1135_vm3, %vm926_vm2  ;;  %v935_v43 = vpack.c.bf16 %v55_v30, %v56_v37  ;;  %v359_v45 = vld [vmem:[%s1654_s3 + $0xf0] sm:$0xff] }
   0xd   :  { %v338_v41 = vld [vmem:[%s1654_s3 + $0x48] sm:$0xff]  ;;  %vm1308_vm5 = vmpackc.low %vm53_vm1, %vm1135_vm3  ;;  %v337_v46 = vld [vmem:[%s1654_s3 + $0x40] sm:$0xff] }
   0xe   :  { %271 = vmatpush.bf16.msra.mxu0 %v1054_v9  ;;  %368 = vmatpush.msra.mxu3 %v341_v27  ;;  %v358_v47 = vld [vmem:[%s1654_s3 + $0xe8] sm:$0xff]  ;;  %v336_v48 = vld [vmem:[%s1654_s3 + $0x38] sm:$0xff]  ;;  %v1331_v49 = vld [vmem:[%s1655_s0 + $0x10] sm:$0xff] }
   0xf   :  { %290 = vmatpush.bf16.msra.mxu1 %v1062_v10  ;;  %v1336_v50 = vld [vmem:[%s1655_s0 + $0x18] sm:$0xff]  ;;  %v357_v51 = vld [vmem:[%s1654_s3 + $0xe0] sm:$0xff]  ;;  %v335_v52 = vld [vmem:[%s1654_s3 + $0x30] sm:$0xff]  ;;  %v44_v54 = vrot.slane %v1331_v49, 7  ;;  %v57_v56 = vrot.slane %v1331_v49, 1 }
  0x10   :  { %309 = vmatpush.bf16.msra.mxu2 %v1070_v11  ;;  %369 = vmatpush.msra.mxu3 %v340_v31  ;;  %v356_v53 = vld [vmem:[%s1654_s3 + $0xd8] sm:$0xff]  ;;  %v45_v55 = vrot.slane %v1336_v50, 7  ;;  %v58_v57 = vrot.slane %v1336_v50, 1  ;;  %v355_v58 = vld [vmem:[%s1654_s3 + $0xd0] sm:$0xff]  ;;  %v354_v59 = vld [vmem:[%s1654_s3 + $0xc8] sm:$0xff]  ;;  %v70_v63 = vpack.c.bf16 %v1336_v50, %v1331_v49 }
  0x11   :  { %v334_v1 = vld [vmem:[%s1654_s3 + $0x28] sm:$0xff]  ;;  %v353_v2 = vld [vmem:[%s1654_s3 + $0xc0] sm:$0xff]  ;;  %v352_v4 = vld [vmem:[%s1654_s3 + $0xb8] sm:$0xff] }
  0x12   :  { %272 = vmatpush.bf16.msra.mxu0 %v1053_v12  ;;  %370 = vmatpush.msra.mxu3 %v339_v35  ;;  %v46_v60 = vsel %vm40_vm0, %v44_v54, %v45_v55  ;;  %v59_v61 = vsel %vm53_vm1, %v57_v56, %v58_v57  ;;  %v333_v3 = vld [vmem:[%s1654_s3 + $0x20] sm:$0xff]  ;;  %v332_v5 = vld [vmem:[%s1654_s3 + $0x18] sm:$0xff]  ;;  %v351_v6 = vld [vmem:[%s1654_s3 + $0xb0] sm:$0xff] }
  0x13   :  { %291 = vmatpush.bf16.msra.mxu1 %v1061_v13  ;;  %v932_v62 = vpack.c.bf16 %v46_v60, %v44_v54  ;;  %v938_v0 = vpack.c.bf16 %v58_v57, %v59_v61  ;;  %v331_v7 = vld [vmem:[%s1654_s3 + $0x10] sm:$0xff]  ;;  %v350_v8 = vld [vmem:[%s1654_s3 + $0xa8] sm:$0xff]  ;;  %v349_v10 = vld [vmem:[%s1654_s3 + $0xa0] sm:$0xff] }
  0x14   :  { %310 = vmatpush.bf16.msra.mxu2 %v1069_v14  ;;  %371 = vmatpush.msra.mxu3 %v338_v41  ;;  %v330_v9 = vld [vmem:[%s1654_s3 + $0x8] sm:$0xff]  ;;  %v329_v11 = vld [vmem:[%s1654_s3] sm:$0xff]  ;;  %v348_v12 = vld [vmem:[%s1654_s3 + $0x98] sm:$0xff] }
  0x15   :  { %v347_v13 = vld [vmem:[%s1654_s3 + $0x90] sm:$0xff]  ;;  %v346_v14 = vld [vmem:[%s1654_s3 + $0x88] sm:$0xff]  ;;  %v1081_v25 = vld [vmem:[%s1657_s5 + $0x38] sm:$0xff] }
  0x16   :  { %273 = vmatpush.bf16.msra.mxu0 %v1052_v15  ;;  %372 = vmatpush.msra.mxu3 %v337_v46  ;;  %v345_v15 = vld [vmem:[%s1654_s3 + $0x80] sm:$0xff]  ;;  %v1088_v26 = vld [vmem:[%s1657_s5 + $0x70] sm:$0xff]  ;;  %v1087_v35 = vld [vmem:[%s1657_s5 + $0x68] sm:$0xff] }
  0x17   :  { %292 = vmatpush.bf16.msra.mxu1 %v1060_v16  ;;  %v1131_v16 = vld [vmem:[%s1653_s2] ss:$0 sm:$0xff]  ;;  %v1096_v27 = vld [vmem:[%s1657_s5 + $0xb0] sm:$0xff]  ;;  %v1079_v37 = vld [vmem:[%s1657_s5 + $0x28] sm:$0xff] }
  0x18   :  { %311 = vmatpush.bf16.msra.mxu2 %v1068_v19  ;;  %373 = vmatpush.msra.mxu3 %v336_v48  ;;  %v1080_v29 = vld [vmem:[%s1657_s5 + $0x30] sm:$0xff]  ;;  %v1078_v60 = vld [vmem:[%s1657_s5 + $0x20] sm:$0xff]  ;;  %v1085_v61 = vld [vmem:[%s1657_s5 + $0x58] sm:$0xff] }
  0x19   :  { %vm1036_vm7 = vmneg %vm431_vm6 }
  0x1a   :  { %274 = vmatpush.bf16.msra.mxu0 %v1051_v23  ;;  %374 = vmatpush.msra.mxu3 %v335_v52  ;;  %v1089_v23 = vld [vmem:[%s1657_s5 + $0x78] sm:$0xff]  ;;  %vm1553_vm9 = vmpackc.low %vm1135_vm3, %vm1036_vm7 }
  0x1b   :  { %293 = vmatpush.bf16.msra.mxu1 %v1059_v24  ;;  %v1097_v24 = vld [vmem:[%s1657_s5 + $0xb8] sm:$0xff]  ;;  %vm1564_vm10 = vmpackc.low %vm444_vm8, %vm1135_vm3 }
  0x1c   :  { %312 = vmatpush.bf16.msra.mxu2 %v1067_v28  ;;  %375 = vmatpush.msra.mxu3 %v334_v1  ;;  %v1092_v1 = vld [vmem:[%s1657_s5 + $0x90] sm:$0xff] }
  0x1e   :  { %275 = vmatpush.bf16.msra.mxu0 %v1050_v32  ;;  %376 = vmatpush.msra.mxu3 %v333_v3  ;;  %v1083_v3 = vld [vmem:[%s1657_s5 + $0x48] sm:$0xff] }
  0x1f   :  { %294 = vmatpush.bf16.msra.mxu1 %v1058_v33 }
  0x20   :  { %313 = vmatpush.bf16.msra.mxu2 %v1066_v36  ;;  %377 = vmatpush.msra.mxu3 %v332_v5  ;;  %v1095_v36 = vld [vmem:[%s1657_s5 + $0xa8] sm:$0xff] }
  0x21   :  { %929 = vmatmul.msk.bf16.vlgmr.msra.gmra.mxu0 %vm1302_vm4, %v928_v39  ;;  %v1086_v39 = vld [vmem:[%s1657_s5 + $0x60] sm:$0xff]  ;;  %v1075_v5 = vld [vmem:[%s1657_s5 + $0x8] sm:$0xff] }
  0x22   :  { %394 = vmatpush.msrb.mxu0 %v360_v38  ;;  %295 = vmatmul.bf16.vlgmr.msra.gmra.mxu1 %v67_v40 }
  0x23   :  { %936 = vmatmul.msk.bf16.vlgmr.msra.gmra.mxu2 %vm1308_vm5, %v935_v43  ;;  %378 = vmatpush.msra.mxu3 %v331_v7  ;;  %v1090_v7 = vld [vmem:[%s1657_s5 + $0x80] sm:$0xff] }
  0x24   :  { %395 = vmatpush.msrb.mxu0 %v359_v45  ;;  %678 = vmatpush.bf16.msrb.mxu2 %v1089_v23 }
  0x25   :  { %379 = vmatpush.msra.mxu3 %v330_v9  ;;  %659 = vmatpush.bf16.msrb.mxu1 %v1081_v25  ;;  %v751_v9 = vld [vmem:[%s1659_s7 + $0xf8] sm:$0xff]  ;;  %v742_v25 = vld [vmem:[%s1659_s7 + $0xb0] sm:$0xff] }
  0x26   :  { %396 = vmatpush.msrb.mxu0 %v358_v47 }
  0x27   :  { %380 = vmatpush.msra.mxu3 %v329_v11  ;;  %v749_v11 = vld [vmem:[%s1659_s7 + $0xe8] sm:$0xff] }
  0x28   :  { %397 = vmatpush.msrb.mxu0 %v357_v51  ;;  %679 = vmatpush.bf16.msrb.mxu2 %v1088_v26 }
  0x29   :  { %697 = vmatpush.bf16.msrb.mxu3 %v1097_v24  ;;  %660 = vmatpush.bf16.msrb.mxu1 %v1080_v29  ;;  %v743_v24 = vld [vmem:[%s1659_s7 + $0xb8] sm:$0xff]  ;;  %v740_v29 = vld [vmem:[%s1659_s7 + $0xa0] sm:$0xff] }
  0x2a   :  { %398 = vmatpush.msrb.mxu0 %v356_v53 }
  0x2c   :  { %399 = vmatpush.msrb.mxu0 %v355_v58  ;;  %680 = vmatpush.bf16.msrb.mxu2 %v1087_v35 }
  0x2d   :  { %698 = vmatpush.bf16.msrb.mxu3 %v1096_v27  ;;  %661 = vmatpush.bf16.msrb.mxu1 %v1079_v37  ;;  %v741_v27 = vld [vmem:[%s1659_s7 + $0xa8] sm:$0xff] }
  0x2e   :  { %400 = vmatpush.msrb.mxu0 %v354_v59  ;;  %v1094_v59 = vld [vmem:[%s1657_s5 + $0xa0] sm:$0xff] }
  0x30   :  { %401 = vmatpush.msrb.mxu0 %v353_v2  ;;  %681 = vmatpush.bf16.msrb.mxu2 %v1086_v39  ;;  %v1076_v2 = vld [vmem:[%s1657_s5 + $0x10] sm:$0xff] }
  0x31   :  { %933 = vmatmul.msk.bf16.gmra.mxu0 %vm1302_vm4, %v932_v62  ;;  %699 = vmatpush.bf16.msrb.mxu3 %v1095_v36  ;;  %v1093_v62 = vld [vmem:[%s1657_s5 + $0x98] sm:$0xff] }
  0x32   :  { %300 = vmatmul.bf16.gmra.mxu1 %v70_v63  ;;  %402 = vmatpush.msrb.mxu0 %v352_v4  ;;  %v1077_v63 = vld [vmem:[%s1657_s5 + $0x18] sm:$0xff]  ;;  %v1091_v4 = vld [vmem:[%s1657_s5 + $0x88] sm:$0xff] }
  0x33   :  { %939 = vmatmul.msk.bf16.gmra.mxu2 %vm1308_vm5, %v938_v0  ;;  %662 = vmatpush.bf16.msrb.mxu1 %v1078_v60  ;;  %v1084_v0 = vld [vmem:[%s1657_s5 + $0x50] sm:$0xff]  ;;  %v735_v60 = vld [vmem:[%s1659_s7 + $0x78] sm:$0xff] }
  0x34   :  { %403 = vmatpush.msrb.mxu0 %v351_v6  ;;  %682 = vmatpush.bf16.msrb.mxu2 %v1085_v61  ;;  %v1082_v6 = vld [vmem:[%s1657_s5 + $0x40] sm:$0xff]  ;;  %v734_v61 = vld [vmem:[%s1659_s7 + $0x70] sm:$0xff] }
  0x35   :  { %700 = vmatpush.bf16.msrb.mxu3 %v1094_v59 }
  0x36   :  { %404 = vmatpush.msrb.mxu0 %v350_v8  ;;  %v1074_v8 = vld [vmem:[%s1657_s5] sm:$0xff] }
  0x37   :  { %663 = vmatpush.bf16.msrb.mxu1 %v1077_v63 }
  0x38   :  { %405 = vmatpush.msrb.mxu0 %v349_v10  ;;  %683 = vmatpush.bf16.msrb.mxu2 %v1084_v0  ;;  %v750_v10 = vld [vmem:[%s1659_s7 + $0xf0] sm:$0xff]  ;;  %v733_v0 = vld [vmem:[%s1659_s7 + $0x68] sm:$0xff] }
  0x39   :  { %701 = vmatpush.bf16.msrb.mxu3 %v1093_v62 }
  0x3a   :  { %406 = vmatpush.msrb.mxu0 %v348_v12 }
  0x3b   :  { %664 = vmatpush.bf16.msrb.mxu1 %v1076_v2 }
  0x3c   :  { %407 = vmatpush.msrb.mxu0 %v347_v13  ;;  %684 = vmatpush.bf16.msrb.mxu2 %v1083_v3  ;;  %v748_v13 = vld [vmem:[%s1659_s7 + $0xe0] sm:$0xff] }
  0x3d   :  { %702 = vmatpush.bf16.msrb.mxu3 %v1092_v1 }
  0x3e   :  { %408 = vmatpush.msrb.mxu0 %v346_v14  ;;  %v747_v14 = vld [vmem:[%s1659_s7 + $0xd8] sm:$0xff] }
  0x3f   :  { %665 = vmatpush.bf16.msrb.mxu1 %v1075_v5  ;;  %v732_v5 = vld [vmem:[%s1659_s7 + $0x60] sm:$0xff] }
  0x40   :  { %409 = vmatpush.msrb.mxu0 %v345_v15  ;;  %685 = vmatpush.bf16.msrb.mxu2 %v1082_v6  ;;  %v1507_v15 = vld [vmem:[%s1656_s4] ss:$0 sm:$0xff] }
  0x41   :  { %410 = vmatmul.f32.vlgmr.msrb.gmra.mxu0 %v1249_v20  ;;  %703 = vmatpush.bf16.msrb.mxu3 %v1091_v4 }
  0x42   :  { %756 = vmatpush.msra.mxu0 %v735_v60 }
  0x43   :  { %666 = vmatpush.bf16.msrb.mxu1 %v1074_v8 }
  0x44   :  { %1098 = vmatpush.msra.mxu2 %v735_v60  ;;  %757 = vmatpush.msra.mxu0 %v734_v61 }
  0x45   :  { %704 = vmatpush.bf16.msrb.mxu3 %v1090_v7 }
  0x46   :  { %1099 = vmatpush.msra.mxu2 %v734_v61  ;;  %758 = vmatpush.msra.mxu0 %v733_v0 }
  0x47   :  { %785 = vmatpush.msra.mxu1 %v751_v9 }
  0x48   :  { %1100 = vmatpush.msra.mxu2 %v733_v0  ;;  %759 = vmatpush.msra.mxu0 %v732_v5 }
  0x49   :  { %413 = vmatmul.f32.gmra.mxu0 %v1254_v21  ;;  %786 = vmatpush.msra.mxu1 %v750_v10 }
  0x4a   :  { %1101 = vmatpush.msra.mxu2 %v732_v5 }
  0x4b   :  { %787 = vmatpush.msra.mxu1 %v749_v11 }
  0x4d   :  { %788 = vmatpush.msra.mxu1 %v748_v13 }
  0x4f   :  { %789 = vmatpush.msra.mxu1 %v747_v14 }
  0x51   :  { %416 = vmatmul.f32.gmra.mxu0 %v1331_v49 }
  0x59   :  { %419 = vmatmul.f32.gmra.mxu0 %v1336_v50 }
  0x9e   :  { %v277_v17 = vpop.f32.mrf.mxu0 }
  0x9f   :  { %v296_v18 = vpop.f32.mrf.mxu1  ;;  %v278_v19 = vadd.f32 %v1131_v16, %v277_v17 }
  0xa1   :  { %v297_v22 = vadd.f32 %v296_v18, %v278_v19  ;;  %v745_v18 = vld [vmem:[%s1659_s7 + $0xc8] sm:$0xff]  ;;  %v744_v19 = vld [vmem:[%s1659_s7 + $0xc0] sm:$0xff] }
  0xa6   :  { %v315_v28 = vpop.f32.mrf.mxu2  ;;  %v279_v31 = vpop.f32.mrf.mxu0 }
  0xa7   :  { %v316_v30 = vadd.f32 %v315_v28, %v297_v22  ;;  %v298_v32 = vpop.f32.mrf.mxu1  ;;  %v280_v34 = vadd.f32 %v1131_v16, %v279_v31 }
  0xa9   :  { %v325_v33 = vmax.f32 %v316_v30, 0.0  ;;  %v299_v38 = vadd.f32 %v298_v32, %v280_v34  ;;  %v739_v32 = vld [vmem:[%s1659_s7 + $0x98] sm:$0xff]  ;;  %v738_v34 = vld [vmem:[%s1659_s7 + $0x90] sm:$0xff] }
  0xab   :  { %381 = vmatmul.f32.vlgmr.msra.gmra.mxu3 %v325_v33 }
  0xac   :  { %1114 = vmatpush.msra.mxu3 %v751_v9 }
  0xae   :  { %v317_v40 = vpop.f32.mrf.mxu2  ;;  %v282_v42 = vpop.f32.mrf.mxu0  ;;  %1115 = vmatpush.msra.mxu3 %v750_v10  ;;  %v731_v10 = vld [vmem:[%s1659_s7 + $0x58] sm:$0xff] }
  0xaf   :  { %v318_v41 = vadd.f32 %v317_v40, %v299_v38  ;;  %v283_v43 = vadd.f32 %v1131_v16, %v282_v42  ;;  %v301_v45 = vpop.f32.mrf.mxu1  ;;  %v737_v38 = vld [vmem:[%s1659_s7 + $0x88] sm:$0xff]  ;;  %760 = vmatpush.msra.mxu0 %v731_v10  ;;  %1102 = vmatpush.msra.mxu2 %v731_v10 }
  0xb0   :  { %1116 = vmatpush.msra.mxu3 %v749_v11  ;;  %v730_v11 = vld [vmem:[%s1659_s7 + $0x50] sm:$0xff] }
  0xb1   :  { %v326_v44 = vmax.f32 %v318_v41, 0.0  ;;  %v302_v46 = vadd.f32 %v301_v45, %v283_v43  ;;  %v736_v45 = vld [vmem:[%s1659_s7 + $0x80] sm:$0xff]  ;;  %761 = vmatpush.msra.mxu0 %v730_v11  ;;  %1103 = vmatpush.msra.mxu2 %v730_v11 }
  0xb2   :  { %1117 = vmatpush.msra.mxu3 %v748_v13  ;;  %v728_v13 = vld [vmem:[%s1659_s7 + $0x40] sm:$0xff] }
  0xb3   :  { %384 = vmatmul.f32.gmra.mxu3 %v326_v44 }
  0xb4   :  { %1118 = vmatpush.msra.mxu3 %v747_v14  ;;  %v727_v14 = vld [vmem:[%s1659_s7 + $0x38] sm:$0xff] }
  0xb6   :  { %v320_v47 = vpop.f32.mrf.mxu2  ;;  %v284_v51 = vpop.f32.mrf.mxu0 }
  0xb7   :  { %v321_v48 = vadd.f32 %v320_v47, %v302_v46  ;;  %v285_v53 = vadd.f32 %v1131_v16, %v284_v51  ;;  %v303_v54 = vpop.f32.mrf.mxu1  ;;  %v746_v16 = vld [vmem:[%s1659_s7 + $0xd0] sm:$0xff] }
  0xb8   :  { %790 = vmatpush.msra.mxu1 %v746_v16  ;;  %1119 = vmatpush.msra.mxu3 %v746_v16  ;;  %v725_v16 = vld [vmem:[%s1659_s7 + $0x28] sm:$0xff] }
  0xb9   :  { %v327_v52 = vmax.f32 %v321_v48, 0.0  ;;  %v304_v55 = vadd.f32 %v303_v54, %v285_v53 }
  0xba   :  { %791 = vmatpush.msra.mxu1 %v745_v18  ;;  %1120 = vmatpush.msra.mxu3 %v745_v18  ;;  %v723_v18 = vld [vmem:[%s1659_s7 + $0x18] sm:$0xff] }
  0xbb   :  { %387 = vmatmul.f32.gmra.mxu3 %v327_v52 }
  0xbc   :  { %792 = vmatpush.msra.mxu1 %v744_v19  ;;  %1121 = vmatpush.msra.mxu3 %v744_v19  ;;  %v722_v19 = vld [vmem:[%s1659_s7 + $0x10] sm:$0xff] }
  0xbe   :  { %v322_v56 = vpop.f32.mrf.mxu2  ;;  %v411_v12 = vpop.f32.mrf.mxu0  ;;  %793 = vmatpush.msra.mxu1 %v743_v24  ;;  %1122 = vmatpush.msra.mxu3 %v743_v24  ;;  %v1133_v24 = vld [vmem:[%s1658_s6] ss:$0 sm:$0xff] }
  0xbf   :  { %v323_v57 = vadd.f32 %v322_v56, %v304_v55 }
  0xc0   :  { %794 = vmatpush.msra.mxu1 %v742_v25  ;;  %1123 = vmatpush.msra.mxu3 %v742_v25 }
  0xc1   :  { %v328_v58 = vmax.f32 %v323_v57, 0.0 }
  0xc2   :  { %795 = vmatpush.msra.mxu1 %v741_v27  ;;  %1124 = vmatpush.msra.mxu3 %v741_v27 }
  0xc3   :  { %390 = vmatmul.f32.gmra.mxu3 %v328_v58 }
  0xc4   :  { %796 = vmatpush.msra.mxu1 %v740_v29  ;;  %1125 = vmatpush.msra.mxu3 %v740_v29 }
  0xc6   :  { %v414_v23 = vpop.f32.mrf.mxu0  ;;  %797 = vmatpush.msra.mxu1 %v739_v32  ;;  %1126 = vmatpush.msra.mxu3 %v739_v32 }
  0xc8   :  { %798 = vmatpush.msra.mxu1 %v738_v34  ;;  %1127 = vmatpush.msra.mxu3 %v738_v34 }
  0xca   :  { %799 = vmatpush.msra.mxu1 %v737_v38  ;;  %1128 = vmatpush.msra.mxu3 %v737_v38 }
  0xcc   :  { %800 = vmatpush.msra.mxu1 %v736_v45  ;;  %1129 = vmatpush.msra.mxu3 %v736_v45 }
  0xce   :  { %v417_v37 = vpop.f32.mrf.mxu0 }
  0xd6   :  { %v420_v56 = vpop.f32.mrf.mxu0 }
 0x12e   :  { %v382_v17 = vpop.f32.mrf.mxu3 }
 0x12f   :  { %v383_v22 = vadd.f32 %v1507_v15, %v382_v17  ;;  %v724_v17 = vld [vmem:[%s1659_s7 + $0x20] sm:$0xff] }
 0x131   :  { %v412_v26 = vadd.f32 %v411_v12, %v383_v22  ;;  %v729_v12 = vld [vmem:[%s1659_s7 + $0x48] sm:$0xff] }
 0x132   :  { %762 = vmatpush.msra.mxu0 %v729_v12  ;;  %1104 = vmatpush.msra.mxu2 %v729_v12  ;;  %v721_v22 = vld [vmem:[%s1659_s7 + $0x8] sm:$0xff] }
 0x133   :  { %v1532_v31 = vmax.f32 %v412_v26, 0.0 }
 0x134   :  { %763 = vmatpush.msra.mxu0 %v728_v13  ;;  %1105 = vmatpush.msra.mxu2 %v728_v13 }
 0x135   :  { %v432_v36 = vrot.slane %v1532_v31, 6  ;;  %v445_v39 = vrot.slane %v1532_v31, 2 }
 0x136   :  { %v385_v28 = vpop.f32.mrf.mxu3  ;;  %764 = vmatpush.msra.mxu0 %v727_v14  ;;  %1106 = vmatpush.msra.mxu2 %v727_v14 }
 0x137   :  { %v386_v30 = vadd.f32 %v1507_v15, %v385_v28 }
 0x139   :  { %v415_v33 = vadd.f32 %v414_v23, %v386_v30  ;;  %v720_v23 = vld [vmem:[%s1659_s7] sm:$0xff] }
 0x13b   :  { %v1540_v35 = vmax.f32 %v415_v33, 0.0 }
 0x13d   :  { %v433_v40 = vrot.slane %v1540_v35, 6  ;;  %v446_v41 = vrot.slane %v1540_v35, 2  ;;  %v458_v42 = vpack.c.bf16 %v1540_v35, %v1532_v31 }
 0x13e   :  { %v388_v43 = vpop.f32.mrf.mxu3 }
 0x13f   :  { %686 = vmatmul.bf16.vlgmr.msrb.gmra.mxu2 %v458_v42  ;;  %v434_v46 = vsel %vm431_vm6, %v432_v36, %v433_v40  ;;  %v447_v47 = vsel %vm444_vm8, %v445_v39, %v446_v41  ;;  %v389_v51 = vadd.f32 %v1507_v15, %v388_v43 }
 0x140   :  { %v1038_v52 = vpack.c.bf16 %v434_v46, %v432_v36  ;;  %v1045_v53 = vpack.c.bf16 %v446_v41, %v447_v47 }
 0x141   :  { %v418_v54 = vadd.f32 %v417_v37, %v389_v51 }
 0x142   :  { %1039 = vmatmul.msk.bf16.vlgmr.msrb.gmra.mxu1 %vm1553_vm9, %v1038_v52  ;;  %1046 = vmatmul.msk.bf16.vlgmr.msrb.gmra.mxu3 %vm1564_vm10, %v1045_v53 }
 0x143   :  { %v425_v58 = vmax.f32 %v418_v54, 0.0 }
 0x145   :  { %v448_v63 = vrot.slane %v425_v58, 2  ;;  %v435_v3 = vrot.slane %v425_v58, 6 }
 0x146   :  { %v391_v55 = vpop.f32.mrf.mxu3 }
 0x147   :  { %v392_v57 = vadd.f32 %v1507_v15, %v391_v55  ;;  %v726_v15 = vld [vmem:[%s1659_s7 + $0x30] sm:$0xff]  ;;  %v1134_v55 = vld [vmem:[%s1660_s8] ss:$0 sm:$0xff] }
 0x148   :  { %765 = vmatpush.msra.mxu0 %v726_v15  ;;  %1107 = vmatpush.msra.mxu2 %v726_v15 }
 0x149   :  { %v421_v59 = vadd.f32 %v420_v56, %v392_v57 }
 0x14a   :  { %766 = vmatpush.msra.mxu0 %v725_v16  ;;  %1108 = vmatpush.msra.mxu2 %v725_v16 }
 0x14b   :  { %v426_v62 = vmax.f32 %v421_v59, 0.0 }
 0x14c   :  { %767 = vmatpush.msra.mxu0 %v724_v17  ;;  %1109 = vmatpush.msra.mxu2 %v724_v17 }
 0x14d   :  { %v436_v1 = vrot.slane %v426_v62, 6  ;;  %v461_v2 = vpack.c.bf16 %v426_v62, %v425_v58  ;;  %v449_v4 = vrot.slane %v426_v62, 2 }
 0x14e   :  { %768 = vmatpush.msra.mxu0 %v723_v18  ;;  %1110 = vmatpush.msra.mxu2 %v723_v18 }
 0x14f   :  { %691 = vmatmul.bf16.gmra.mxu2 %v461_v2  ;;  %v437_v6 = vsel %vm431_vm6, %v435_v3, %v436_v1  ;;  %v450_v7 = vsel %vm444_vm8, %v448_v63, %v449_v4 }
 0x150   :  { %v1042_v8 = vpack.c.bf16 %v437_v6, %v435_v3  ;;  %v1048_v9 = vpack.c.bf16 %v449_v4, %v450_v7  ;;  %769 = vmatpush.msra.mxu0 %v722_v19  ;;  %1111 = vmatpush.msra.mxu2 %v722_v19 }
 0x152   :  { %1043 = vmatmul.msk.bf16.gmra.mxu1 %vm1553_vm9, %v1042_v8  ;;  %1049 = vmatmul.msk.bf16.gmra.mxu3 %vm1564_vm10, %v1048_v9 }
 0x153   :  { %770 = vmatpush.msra.mxu0 %v721_v22  ;;  %1112 = vmatpush.msra.mxu2 %v721_v22 }
 0x155   :  { %771 = vmatpush.msra.mxu0 %v720_v23  ;;  %1113 = vmatpush.msra.mxu2 %v720_v23 }
 0x162   :  { %801 = vmatmul.f32.vlgmr.msra.gmra.mxu1 %v1532_v31  ;;  %807 = vmatmul.f32.vlgmr.msra.gmra.mxu3 %v425_v58 }
 0x16a   :  { %804 = vmatmul.f32.gmra.mxu1 %v1540_v35  ;;  %810 = vmatmul.f32.gmra.mxu3 %v426_v62 }
 0x1bf   :  { %v668_v25 = vpop.f32.mrf.mxu1 }
 0x1c0   :  { %v669_v26 = vadd.f32 %v1133_v24, %v668_v25 }
 0x1c2   :  { %v687_v27 = vpop.f32.mrf.mxu2 }
 0x1c3   :  { %v688_v28 = vadd.f32 %v687_v27, %v669_v26 }
 0x1c5   :  { %v706_v29 = vpop.f32.mrf.mxu3 }
 0x1c6   :  { %v707_v30 = vadd.f32 %v706_v29, %v688_v28 }
 0x1c7   :  { %v670_v31 = vpop.f32.mrf.mxu1 }
 0x1c8   :  { %v716_v32 = vmax.f32 %v707_v30, 0.0  ;;  %v671_v33 = vadd.f32 %v1133_v24, %v670_v31 }
 0x1ca   :  { %v689_v34 = vpop.f32.mrf.mxu2  ;;  %772 = vmatmul.f32.vlgmr.msra.gmra.mxu0 %v716_v32 }
 0x1cb   :  { %v690_v35 = vadd.f32 %v689_v34, %v671_v33 }
 0x1cd   :  { %v708_v36 = vpop.f32.mrf.mxu3 }
 0x1ce   :  { %v709_v37 = vadd.f32 %v708_v36, %v690_v35 }
 0x1cf   :  { %v673_v38 = vpop.f32.mrf.mxu1 }
 0x1d0   :  { %v717_v39 = vmax.f32 %v709_v37, 0.0  ;;  %v674_v40 = vadd.f32 %v1133_v24, %v673_v38 }
 0x1d2   :  { %v692_v41 = vpop.f32.mrf.mxu2  ;;  %775 = vmatmul.f32.gmra.mxu0 %v717_v39 }
 0x1d3   :  { %v693_v42 = vadd.f32 %v692_v41, %v674_v40 }
 0x1d5   :  { %v711_v43 = vpop.f32.mrf.mxu3 }
 0x1d6   :  { %v712_v44 = vadd.f32 %v711_v43, %v693_v42 }
 0x1d7   :  { %v675_v45 = vpop.f32.mrf.mxu1 }
 0x1d8   :  { %v718_v46 = vmax.f32 %v712_v44, 0.0  ;;  %v676_v47 = vadd.f32 %v1133_v24, %v675_v45 }
 0x1da   :  { %v694_v48 = vpop.f32.mrf.mxu2  ;;  %778 = vmatmul.f32.vlgmr.msra.gmra.mxu2 %v718_v46 }
 0x1db   :  { %v695_v51 = vadd.f32 %v694_v48, %v676_v47 }
 0x1dd   :  { %v713_v52 = vpop.f32.mrf.mxu3 }
 0x1de   :  { %v714_v53 = vadd.f32 %v713_v52, %v695_v51 }
 0x1df   :  { %v802_v56 = vpop.f32.mrf.mxu1 }
 0x1e0   :  { %v719_v54 = vmax.f32 %v714_v53, 0.0 }
 0x1e2   :  { %781 = vmatmul.f32.gmra.mxu2 %v719_v54 }
 0x1e5   :  { %v808_v4 = vpop.f32.mrf.mxu3 }
 0x1e7   :  { %v805_v0 = vpop.f32.mrf.mxu1 }
 0x1ed   :  { %v811_v11 = vpop.f32.mrf.mxu3 }
 0x247   :  { %v773_v57 = vpop.f32.mrf.mxu0 }
 0x248   :  { %v774_v58 = vadd.f32 %v1134_v55, %v773_v57 }
 0x24a   :  { %v803_v59 = vadd.f32 %v802_v56, %v774_v58 }
 0x24c   :  { %v814_v60 = vadd.f32 %v803_v59, %v1249_v20 }
 0x24e   :  { %v818_v61 = vmax.f32 %v814_v60, 0.0 }
 0x24f   :  { %v776_v62 = vpop.f32.mrf.mxu0 }
 0x250   :  { %822 = vst [vmem:[%s1661_s9] sm:$0xff] %v818_v61  ;;  %v777_v63 = vadd.f32 %v1134_v55, %v776_v62 }
 0x252   :  { %v806_v1 = vadd.f32 %v805_v0, %v777_v63 }
 0x254   :  { %v815_v2 = vadd.f32 %v806_v1, %v1254_v21 }
 0x256   :  { %v819_v3 = vmax.f32 %v815_v2, 0.0 }
 0x258   :  { %823 = vst [vmem:[%s1661_s9 + $0x8] sm:$0xff] %v819_v3 }
 0x25d   :  { %v779_v5 = vpop.f32.mrf.mxu2 }
 0x25e   :  { %v780_v6 = vadd.f32 %v1134_v55, %v779_v5 }
 0x260   :  { %v809_v20 = vadd.f32 %v808_v4, %v780_v6 }
 0x262   :  { %v816_v7 = vadd.f32 %v809_v20, %v1331_v49 }
 0x264   :  { %v820_v8 = vmax.f32 %v816_v7, 0.0 }
 0x265   :  { %v782_v9 = vpop.f32.mrf.mxu2 }
 0x266   :  { %824 = vst [vmem:[%s1661_s9 + $0x10] sm:$0xff] %v820_v8  ;;  %v783_v10 = vadd.f32 %v1134_v55, %v782_v9 }
 0x268   :  { %v812_v21 = vadd.f32 %v811_v11, %v783_v10 }
 0x26a   :  { %v817_v12 = vadd.f32 %v812_v21, %v1336_v50 }
 0x26c   :  { %v821_v13 = vmax.f32 %v817_v12, 0.0 }
 0x26e   :  { %825 = vst [vmem:[%s1661_s9 + $0x18] sm:$0xff] %v821_v13 }

</bundles_post_ra>
